<compile_context>
chip_gen: v7x
topology: tpu7x:2x2x1
jax: 0.10.0
libtpu: 0.0.40
codegen_flags: <defaults>
</compile_context>

<pallas_src>
import functools

import jax
import jax.numpy as jnp
from jax.experimental import pallas as pl
from jax.experimental.pallas import tpu as pltpu

_MIB = 1024 * 1024


def _vmem_limit_bytes():
    """Generation-aware scoped-VMEM limit: half of physical, capped at 64 MiB."""
    cap = 64 * _MIB  # conservative default (v7x per-TensorCore physical VMEM)
    try:
        info = pltpu.get_tpu_info()
        cap = int(getattr(info, "vmem_capacity_bytes", cap) or cap)
    except Exception:
        pass
    return int(min(cap // 2, 64 * _MIB))


def _largest_tile(hw, max_t):
    """Largest legal HW tile t <= max_t with t == hw, or (t % 128 == 0 and t | hw).
    Returns None if no such tile exists."""
    if hw <= max_t:
        return hw
    t = (max_t // 128) * 128
    while t >= 128:
        if hw % t == 0:
            return t
        t -= 128
    return None


# --------------------------------------------------------------------------
# Fused single-pass kernel: GAP + MLP (MXU) + softmax + scale, one sample/step.
# --------------------------------------------------------------------------
def _msff_fused_kernel(x3_ref, x5_ref, x7_ref,
                       w1_ref, b1_ref, w2_ref, b2_ref,
                       o_ref, *, inv_hw):
    # Blocks: x*/o (1, C, HW); weights full-extent (resident, tiny).
    x3 = x3_ref[...].astype(jnp.float32)
    x5 = x5_ref[...].astype(jnp.float32)
    x7 = x7_ref[...].astype(jnp.float32)

    # GAP over the lane-dense HW axis; keep channel values in column form
    # (C on sublanes) so no lane<->sublane relayout is needed anywhere.
    g3 = jnp.sum(x3, axis=2, keepdims=True)[0] * inv_hw   # (C, 1)
    g5 = jnp.sum(x5, axis=2, keepdims=True)[0] * inv_hw
    g7 = jnp.sum(x7, axis=2, keepdims=True)[0] * inv_hw

    def mlp(gcol, i):
        # Weights are in torch (out, in) layout; column-vector matmuls on MXU.
        w1 = w1_ref[i].astype(jnp.float32)   # (Co, C)
        b1 = b1_ref[i].astype(jnp.float32)   # (Co, 1)
        w2 = w2_ref[i].astype(jnp.float32)   # (C, Co)
        b2 = b2_ref[i].astype(jnp.float32)   # (C, 1)
        h = jnp.dot(w1, gcol, preferred_element_type=jnp.float32) + b1   # (Co, 1)
        return jnp.dot(w2, h, preferred_element_type=jnp.float32) + b2   # (C, 1)

    c3 = mlp(g3, 0)
    c5 = mlp(g5, 1)
    c7 = mlp(g7, 2)

    # Joint softmax over the concatenated 3*C logits (per sample).
    m = jnp.maximum(
        jnp.maximum(jnp.max(c3, axis=0, keepdims=True),
                    jnp.max(c5, axis=0, keepdims=True)),
        jnp.max(c7, axis=0, keepdims=True))                # (1, 1)
    e3 = jnp.exp(c3 - m)
    e5 = jnp.exp(c5 - m)
    e7 = jnp.exp(c7 - m)
    inv_z = 1.0 / (jnp.sum(e3, axis=0, keepdims=True)
                   + jnp.sum(e5, axis=0, keepdims=True)
                   + jnp.sum(e7, axis=0, keepdims=True))   # (1, 1)

    s3 = (e3 * inv_z)[None]    # (1, C, 1), broadcasts over the HW lanes
    s5 = (e5 * inv_z)[None]
    s7 = (e7 * inv_z)[None]

    # Re-scale straight from VMEM (no second HBM read of x3/x5/x7).
    o_ref[...] = (x3 * s3 + x5 * s5 + x7 * s7).astype(o_ref.dtype)


# --------------------------------------------------------------------------
# Two-pass fallback kernels.
# --------------------------------------------------------------------------
def _gap_kernel(x3_ref, x5_ref, x7_ref, g3_ref, g5_ref, g7_ref,
                acc3, acc5, acc7, *, inv_hw):
    """Grid (N, HW_tiles): accumulate per-channel spatial sums (f32 scratch);
    emit channel means on the last HW tile.  MLP/softmax happen outside."""
    t = pl.program_id(1)

    @pl.when(t == 0)
    def _init():
        acc3[...] = jnp.zeros_like(acc3)
        acc5[...] = jnp.zeros_like(acc5)
        acc7[...] = jnp.zeros_like(acc7)

    acc3[...] += jnp.sum(x3_ref[...].astype(jnp.float32), axis=2)
    acc5[...] += jnp.sum(x5_ref[...].astype(jnp.float32), axis=2)
    acc7[...] += jnp.sum(x7_ref[...].astype(jnp.float32), axis=2)

    @pl.when(t == pl.num_programs(1) - 1)
    def _finalize():
        g3_ref[...] = (acc3[...] * inv_hw)[None]   # (1, 1, C)
        g5_ref[...] = (acc5[...] * inv_hw)[None]
        g7_ref[...] = (acc7[...] * inv_hw)[None]


def _scale_sum_kernel(x3_ref, x5_ref, x7_ref, s3_ref, s5_ref, s7_ref, o_ref):
    """out = x3*s3 + x5*s5 + x7*s7 with per-channel scales (1, C, 1) broadcast
    along the lane-dense HW axis."""
    acc = (x3_ref[...].astype(jnp.float32) * s3_ref[...]
           + x5_ref[...].astype(jnp.float32) * s5_ref[...]
           + x7_ref[...].astype(jnp.float32) * s7_ref[...])
    o_ref[...] = acc.astype(o_ref.dtype)


# --------------------------------------------------------------------------
# Wrapper.
# --------------------------------------------------------------------------
def msff_forward(x3, x5, x7, w1s, b1s, w2s, b2s, *, force_two_pass=False):
    """x_k: (N, C, H, W).  Per-branch params in torch (out, in) layout, branch
    order [3, 5, 7]:
      w1s (3, Co, C), b1s (3, Co, 1), w2s (3, C, Co), b2s (3, C, 1).
    Returns (N, C, H, W)."""
    N, C, H, W = x3.shape
    HW = H * W
    in_b = x3.dtype.itemsize
    out_b = in_b

    vmem_limit = _vmem_limit_bytes()
    budget = max(_MIB, vmem_limit - 4 * _MIB)

    # Lane-dense spatial layout (N, C, H*W); contiguous reshape, free.
    x3f = x3.reshape(N, C, HW)
    x5f = x5.reshape(N, C, HW)
    x7f = x7.reshape(N, C, HW)

    # ---------------- fused single-pass path ----------------
    weight_bytes = 2 * 4 * (w1s.size + b1s.size + w2s.size + b2s.size)
    fused_need = C * HW * (2 * 3 * in_b + 2 * out_b + 3 * 4) + weight_bytes
    if (not force_two_pass) and fused_need <= budget:
        xspec = pl.BlockSpec((1, C, HW), lambda n: (n, 0, 0))

        def full_spec(shape):
            return pl.BlockSpec(shape, lambda n: (0, 0, 0))

        out_f = pl.pallas_call(
            functools.partial(_msff_fused_kernel, inv_hw=1.0 / float(HW)),
            out_shape=jax.ShapeDtypeStruct((N, C, HW), x3.dtype),
            grid_spec=pltpu.PrefetchScalarGridSpec(
                num_scalar_prefetch=0,
                grid=(N,),
                in_specs=[
                    xspec, xspec, xspec,
                    full_spec(w1s.shape), full_spec(b1s.shape),
                    full_spec(w2s.shape), full_spec(b2s.shape),
                ],
                out_specs=pl.BlockSpec((1, C, HW), lambda n: (n, 0, 0)),
            ),
            compiler_params=pltpu.CompilerParams(
                dimension_semantics=("parallel",),
                vmem_limit_bytes=vmem_limit),
        )(x3f, x5f, x7f, w1s, b1s, w2s, b2s)
        return out_f.reshape(N, C, H, W)

    # ---------------- two-pass streaming fallback ----------------
    # Pass 2 streams 4 arrays (3 in + 1 out); pass 1 only 3 -> bigger tile.
    max_t2 = max(1, budget // (2 * 4 * C * (in_b + 4)))
    t2 = _largest_tile(HW, max_t2)
    if t2 is None:
        # No 128-multiple divisor tile: zero-pad HW to a tile multiple instead
        # of using a full-extent (VMEM-blowing) block.
        t2 = max(128, (max_t2 // 128) * 128)
        hw_pad = -(-HW // t2) * t2
    else:
        hw_pad = HW
    max_t1 = max(1, budget // (2 * 3 * C * (in_b + 4)))
    t1 = _largest_tile(hw_pad, max_t1) or t2

    if hw_pad != HW:
        pad = ((0, 0), (0, 0), (0, hw_pad - HW))
        x3f = jnp.pad(x3f, pad)   # zeros keep the GAP sums exact
        x5f = jnp.pad(x5f, pad)
        x7f = jnp.pad(x7f, pad)

    # ---- Pass 1: GAP only (channel means). ----
    x1spec = pl.BlockSpec((1, C, t1), lambda n, t: (n, 0, t))
    gap_spec = pl.BlockSpec((1, 1, C), lambda n, t: (n, 0, 0))
    g3, g5, g7 = pl.pallas_call(
        functools.partial(_gap_kernel, inv_hw=1.0 / float(HW)),
        out_shape=(jax.ShapeDtypeStruct((N, 1, C), jnp.float32),) * 3,
        grid_spec=pltpu.PrefetchScalarGridSpec(
            num_scalar_prefetch=0,
            grid=(N, hw_pad // t1),
            in_specs=[x1spec, x1spec, x1spec],
            out_specs=(gap_spec, gap_spec, gap_spec),
            scratch_shapes=[pltpu.VMEM((1, C), jnp.float32)] * 3,
        ),
        compiler_params=pltpu.CompilerParams(
            dimension_semantics=("parallel", "arbitrary"),
            vmem_limit_bytes=vmem_limit),
    )(x3f, x5f, x7f)

    # Tiny per-sample MLPs + joint softmax as batched XLA matmuls: keeps the
    # streaming kernels' critical path free of epilogue / vreg-spill risk.
    def mlp(g, i):
        w1 = w1s[i].astype(jnp.float32)
        w2 = w2s[i].astype(jnp.float32)
        h = g.reshape(N, C) @ w1.T + b1s[i].astype(jnp.float32)[:, 0]
        return h @ w2.T + b2s[i].astype(jnp.float32)[:, 0]

    logits = jnp.concatenate([mlp(g3, 0), mlp(g5, 1), mlp(g7, 2)], axis=1)
    wts = jax.nn.softmax(logits, axis=1)
    s3, s5, s7 = jnp.split(wts, 3, axis=1)         # (N, C) each
    s3b = s3.reshape(N, C, 1)
    s5b = s5.reshape(N, C, 1)
    s7b = s7.reshape(N, C, 1)

    # ---- Pass 2: weighted sum, lane-dense stores, both axes parallel. ----
    x2spec = pl.BlockSpec((1, C, t2), lambda n, t: (n, 0, t))
    sspec = pl.BlockSpec((1, C, 1), lambda n, t: (n, 0, 0))
    out_f = pl.pallas_call(
        _scale_sum_kernel,
        out_shape=jax.ShapeDtypeStruct((N, C, hw_pad), x3.dtype),
        grid_spec=pltpu.PrefetchScalarGridSpec(
            num_scalar_prefetch=0,
            grid=(N, hw_pad // t2),
            in_specs=[x2spec, x2spec, x2spec, sspec, sspec, sspec],
            out_specs=pl.BlockSpec((1, C, t2), lambda n, t: (n, 0, t)),
        ),
        compiler_params=pltpu.CompilerParams(
            dimension_semantics=("parallel", "parallel"),
            vmem_limit_bytes=vmem_limit),
    )(x3f, x5f, x7f, s3b, s5b, s7b)

    if hw_pad != HW:
        out_f = out_f[:, :, :HW]
    return out_f.reshape(N, C, H, W)


# --------------------------------------------------------------------------
# Pure-JAX reference (torch semantics: y = x @ W.T + b).
# --------------------------------------------------------------------------
def _reference(x3, x5, x7, w1s, b1s, w2s, b2s):
    def branch(x, i):
        g = jnp.mean(x.astype(jnp.float32), axis=(2, 3))                       # (N, C)
        h = g @ w1s[i].astype(jnp.float32).T + b1s[i].astype(jnp.float32)[:, 0]
        return h @ w2s[i].astype(jnp.float32).T + b2s[i].astype(jnp.float32)[:, 0]

    c = jnp.concatenate([branch(x3, 0), branch(x5, 1), branch(x7, 2)], axis=1)
    w = jax.nn.softmax(c, axis=1)
    s3, s5, s7 = jnp.split(w, 3, axis=1)
    y = (x3.astype(jnp.float32) * s3[:, :, None, None]
         + x5.astype(jnp.float32) * s5[:, :, None, None]
         + x7.astype(jnp.float32) * s7[:, :, None, None])
    return y.astype(x3.dtype)


if __name__ == "__main__":
    key = jax.random.PRNGKey(0)
    ks = jax.random.split(key, 7)

    N, C, H, W = 2, 16, 16, 16
    r = 4
    Co = C // r if C % r == 0 else C // r + 1

    x3 = jax.random.normal(ks[0], (N, C, H, W), dtype=jnp.float32)
    x5 = jax.random.normal(ks[1], (N, C, H, W), dtype=jnp.float32)
    x7 = jax.random.normal(ks[2], (N, C, H, W), dtype=jnp.float32)

    # Per-branch Linear params, torch (out, in) layout, branch order [3, 5, 7].
    w1s = jax.random.normal(ks[3], (3, Co, C), dtype=jnp.float32) * 0.5
    b1s = jax.random.normal(ks[4], (3, Co, 1), dtype=jnp.float32) * 0.1
    w2s = jax.random.normal(ks[5], (3, C, Co), dtype=jnp.float32) * 0.5
    b2s = jax.random.normal(ks[6], (3, C, 1), dtype=jnp.float32) * 0.1

    ref = _reference(x3, x5, x7, w1s, b1s, w2s, b2s)

    # Fused single-pass path (one sample per grid step, MLP on the MXU).
    out_fused = jax.block_until_ready(
        msff_forward(x3, x5, x7, w1s, b1s, w2s, b2s))
    assert out_fused.shape == (N, C, H, W)
    assert jnp.allclose(out_fused, ref, atol=5e-4, rtol=5e-4), \
        "fused path mismatch vs reference"

    # Two-pass streaming fallback (exercised explicitly).
    out_stream = jax.block_until_ready(
        msff_forward(x3, x5, x7, w1s, b1s, w2s, b2s, force_two_pass=True))
    assert out_stream.shape == (N, C, H, W)
    assert jnp.allclose(out_stream, ref, atol=5e-4, rtol=5e-4), \
        "two-pass path mismatch vs reference"

    print("KERNEL_OK")
</pallas_src>

<mosaic_0001>
module attributes {stable_mosaic.version = 11 : i64} {
  func.func @_msff_fused_kernel(%arg0: i32, %arg1: memref<1x16x256xf32, #tpu.memory_space<vmem>>, %arg2: memref<1x16x256xf32, #tpu.memory_space<vmem>>, %arg3: memref<1x16x256xf32, #tpu.memory_space<vmem>>, %arg4: memref<3x4x16xf32, #tpu.memory_space<vmem>>, %arg5: memref<3x4x1xf32, #tpu.memory_space<vmem>>, %arg6: memref<3x16x4xf32, #tpu.memory_space<vmem>>, %arg7: memref<3x16x1xf32, #tpu.memory_space<vmem>>, %arg8: memref<1x16x256xf32, #tpu.memory_space<vmem>>) attributes {dimension_semantics = [#tpu.dimension_semantics<parallel>], iteration_bounds = array<i64: 2>, scalar_prefetch = 0 : i64, scratch_operands = 0 : i64, tpu.core_type = #tpu.core_type<tc>, window_params = [{transform_indices = @transform_0, window_bounds = array<i64: 1, 16, 256>}, {transform_indices = @transform_1, window_bounds = array<i64: 1, 16, 256>}, {transform_indices = @transform_2, window_bounds = array<i64: 1, 16, 256>}, {pipeline_mode = #tpu.pipeline_mode<synchronous>, transform_indices = @transform_3, window_bounds = array<i64: 3, 4, 16>}, {pipeline_mode = #tpu.pipeline_mode<synchronous>, transform_indices = @transform_4, window_bounds = array<i64: 3, 4, 1>}, {pipeline_mode = #tpu.pipeline_mode<synchronous>, transform_indices = @transform_5, window_bounds = array<i64: 3, 16, 4>}, {pipeline_mode = #tpu.pipeline_mode<synchronous>, transform_indices = @transform_6, window_bounds = array<i64: 3, 16, 1>}, {transform_indices = @transform_7, window_bounds = array<i64: 1, 16, 256>}]} {
    %c0 = arith.constant 0 : index
    %c0_0 = arith.constant 0 : index
    %c0_1 = arith.constant 0 : index
    %0 = vector.load %arg1[%c0, %c0_0, %c0_1] : memref<1x16x256xf32, #tpu.memory_space<vmem>>, vector<1x16x256xf32>
    %c0_2 = arith.constant 0 : index
    %c0_3 = arith.constant 0 : index
    %c0_4 = arith.constant 0 : index
    %1 = vector.load %arg2[%c0_2, %c0_3, %c0_4] : memref<1x16x256xf32, #tpu.memory_space<vmem>>, vector<1x16x256xf32>
    %c0_5 = arith.constant 0 : index
    %c0_6 = arith.constant 0 : index
    %c0_7 = arith.constant 0 : index
    %2 = vector.load %arg3[%c0_5, %c0_6, %c0_7] : memref<1x16x256xf32, #tpu.memory_space<vmem>>, vector<1x16x256xf32>
    %cst = arith.constant dense<0.000000e+00> : vector<1x16xf32>
    %3 = vector.multi_reduction <add>, %0, %cst [2] : vector<1x16x256xf32> to vector<1x16xf32>
    %4 = vector.shape_cast %3 : vector<1x16xf32> to vector<1x16x1xf32>
    %5 = vector.shape_cast %4 : vector<1x16x1xf32> to vector<16x1xf32>
    %cst_8 = arith.constant 3.906250e-03 : f32
    %6 = vector.broadcast %cst_8 : f32 to vector<16x1xf32>
    %7 = arith.mulf %5, %6 : vector<16x1xf32>
    %cst_9 = arith.constant dense<0.000000e+00> : vector<1x16xf32>
    %8 = vector.multi_reduction <add>, %1, %cst_9 [2] : vector<1x16x256xf32> to vector<1x16xf32>
    %9 = vector.shape_cast %8 : vector<1x16xf32> to vector<1x16x1xf32>
    %10 = vector.shape_cast %9 : vector<1x16x1xf32> to vector<16x1xf32>
    %cst_10 = arith.constant 3.906250e-03 : f32
    %11 = vector.broadcast %cst_10 : f32 to vector<16x1xf32>
    %12 = arith.mulf %10, %11 : vector<16x1xf32>
    %cst_11 = arith.constant dense<0.000000e+00> : vector<1x16xf32>
    %13 = vector.multi_reduction <add>, %2, %cst_11 [2] : vector<1x16x256xf32> to vector<1x16xf32>
    %14 = vector.shape_cast %13 : vector<1x16xf32> to vector<1x16x1xf32>
    %15 = vector.shape_cast %14 : vector<1x16x1xf32> to vector<16x1xf32>
    %cst_12 = arith.constant 3.906250e-03 : f32
    %16 = vector.broadcast %cst_12 : f32 to vector<16x1xf32>
    %17 = arith.mulf %15, %16 : vector<16x1xf32>
    %c0_13 = arith.constant 0 : index
    %c0_14 = arith.constant 0 : index
    %c0_15 = arith.constant 0 : index
    %18 = vector.load %arg4[%c0_13, %c0_14, %c0_15] : memref<3x4x16xf32, #tpu.memory_space<vmem>>, vector<1x4x16xf32>
    %19 = vector.shape_cast %18 : vector<1x4x16xf32> to vector<4x16xf32>
    %c0_16 = arith.constant 0 : index
    %c0_17 = arith.constant 0 : index
    %c0_18 = arith.constant 0 : index
    %20 = vector.load %arg5[%c0_16, %c0_17, %c0_18] : memref<3x4x1xf32, #tpu.memory_space<vmem>>, vector<1x4x1xf32>
    %21 = vector.shape_cast %20 : vector<1x4x1xf32> to vector<4x1xf32>
    %c0_19 = arith.constant 0 : index
    %c0_20 = arith.constant 0 : index
    %c0_21 = arith.constant 0 : index
    %22 = vector.load %arg6[%c0_19, %c0_20, %c0_21] : memref<3x16x4xf32, #tpu.memory_space<vmem>>, vector<1x16x4xf32>
    %23 = vector.shape_cast %22 : vector<1x16x4xf32> to vector<16x4xf32>
    %c0_22 = arith.constant 0 : index
    %c0_23 = arith.constant 0 : index
    %c0_24 = arith.constant 0 : index
    %24 = vector.load %arg7[%c0_22, %c0_23, %c0_24] : memref<3x16x1xf32, #tpu.memory_space<vmem>>, vector<1x16x1xf32>
    %25 = vector.shape_cast %24 : vector<1x16x1xf32> to vector<16x1xf32>
    %cst_25 = arith.constant dense<0.000000e+00> : vector<4x1xf32>
    %26 = tpu.matmul %19, %7, %cst_25 {dimension_numbers = #tpu.dot_dimension_numbers<[1], [0], [0], [1], [0, 0, 1, 1], [], []>} : vector<4x16xf32>, vector<16x1xf32>, vector<4x1xf32> -> vector<4x1xf32>
    %27 = arith.addf %26, %21 : vector<4x1xf32>
    %cst_26 = arith.constant dense<0.000000e+00> : vector<16x1xf32>
    %28 = tpu.matmul %23, %27, %cst_26 {dimension_numbers = #tpu.dot_dimension_numbers<[1], [0], [0], [1], [0, 0, 1, 1], [], []>} : vector<16x4xf32>, vector<4x1xf32>, vector<16x1xf32> -> vector<16x1xf32>
    %29 = arith.addf %28, %25 : vector<16x1xf32>
    %c1 = arith.constant 1 : index
    %c0_27 = arith.constant 0 : index
    %c0_28 = arith.constant 0 : index
    %30 = vector.load %arg4[%c1, %c0_27, %c0_28] : memref<3x4x16xf32, #tpu.memory_space<vmem>>, vector<1x4x16xf32>
    %31 = vector.shape_cast %30 : vector<1x4x16xf32> to vector<4x16xf32>
    %c1_29 = arith.constant 1 : index
    %c0_30 = arith.constant 0 : index
    %c0_31 = arith.constant 0 : index
    %32 = vector.load %arg5[%c1_29, %c0_30, %c0_31] : memref<3x4x1xf32, #tpu.memory_space<vmem>>, vector<1x4x1xf32>
    %33 = vector.shape_cast %32 : vector<1x4x1xf32> to vector<4x1xf32>
    %c1_32 = arith.constant 1 : index
    %c0_33 = arith.constant 0 : index
    %c0_34 = arith.constant 0 : index
    %34 = vector.load %arg6[%c1_32, %c0_33, %c0_34] : memref<3x16x4xf32, #tpu.memory_space<vmem>>, vector<1x16x4xf32>
    %35 = vector.shape_cast %34 : vector<1x16x4xf32> to vector<16x4xf32>
    %c1_35 = arith.constant 1 : index
    %c0_36 = arith.constant 0 : index
    %c0_37 = arith.constant 0 : index
    %36 = vector.load %arg7[%c1_35, %c0_36, %c0_37] : memref<3x16x1xf32, #tpu.memory_space<vmem>>, vector<1x16x1xf32>
    %37 = vector.shape_cast %36 : vector<1x16x1xf32> to vector<16x1xf32>
    %cst_38 = arith.constant dense<0.000000e+00> : vector<4x1xf32>
    %38 = tpu.matmul %31, %12, %cst_38 {dimension_numbers = #tpu.dot_dimension_numbers<[1], [0], [0], [1], [0, 0, 1, 1], [], []>} : vector<4x16xf32>, vector<16x1xf32>, vector<4x1xf32> -> vector<4x1xf32>
    %39 = arith.addf %38, %33 : vector<4x1xf32>
    %cst_39 = arith.constant dense<0.000000e+00> : vector<16x1xf32>
    %40 = tpu.matmul %35, %39, %cst_39 {dimension_numbers = #tpu.dot_dimension_numbers<[1], [0], [0], [1], [0, 0, 1, 1], [], []>} : vector<16x4xf32>, vector<4x1xf32>, vector<16x1xf32> -> vector<16x1xf32>
    %41 = arith.addf %40, %37 : vector<16x1xf32>
    %c2 = arith.constant 2 : index
    %c0_40 = arith.constant 0 : index
    %c0_41 = arith.constant 0 : index
    %42 = vector.load %arg4[%c2, %c0_40, %c0_41] : memref<3x4x16xf32, #tpu.memory_space<vmem>>, vector<1x4x16xf32>
    %43 = vector.shape_cast %42 : vector<1x4x16xf32> to vector<4x16xf32>
    %c2_42 = arith.constant 2 : index
    %c0_43 = arith.constant 0 : index
    %c0_44 = arith.constant 0 : index
    %44 = vector.load %arg5[%c2_42, %c0_43, %c0_44] : memref<3x4x1xf32, #tpu.memory_space<vmem>>, vector<1x4x1xf32>
    %45 = vector.shape_cast %44 : vector<1x4x1xf32> to vector<4x1xf32>
    %c2_45 = arith.constant 2 : index
    %c0_46 = arith.constant 0 : index
    %c0_47 = arith.constant 0 : index
    %46 = vector.load %arg6[%c2_45, %c0_46, %c0_47] : memref<3x16x4xf32, #tpu.memory_space<vmem>>, vector<1x16x4xf32>
    %47 = vector.shape_cast %46 : vector<1x16x4xf32> to vector<16x4xf32>
    %c2_48 = arith.constant 2 : index
    %c0_49 = arith.constant 0 : index
    %c0_50 = arith.constant 0 : index
    %48 = vector.load %arg7[%c2_48, %c0_49, %c0_50] : memref<3x16x1xf32, #tpu.memory_space<vmem>>, vector<1x16x1xf32>
    %49 = vector.shape_cast %48 : vector<1x16x1xf32> to vector<16x1xf32>
    %cst_51 = arith.constant dense<0.000000e+00> : vector<4x1xf32>
    %50 = tpu.matmul %43, %17, %cst_51 {dimension_numbers = #tpu.dot_dimension_numbers<[1], [0], [0], [1], [0, 0, 1, 1], [], []>} : vector<4x16xf32>, vector<16x1xf32>, vector<4x1xf32> -> vector<4x1xf32>
    %51 = arith.addf %50, %45 : vector<4x1xf32>
    %cst_52 = arith.constant dense<0.000000e+00> : vector<16x1xf32>
    %52 = tpu.matmul %47, %51, %cst_52 {dimension_numbers = #tpu.dot_dimension_numbers<[1], [0], [0], [1], [0, 0, 1, 1], [], []>} : vector<16x4xf32>, vector<4x1xf32>, vector<16x1xf32> -> vector<16x1xf32>
    %53 = arith.addf %52, %49 : vector<16x1xf32>
    %cst_53 = arith.constant dense<0xFF800000> : vector<1xf32>
    %54 = vector.multi_reduction <maximumf>, %29, %cst_53 [0] : vector<16x1xf32> to vector<1xf32>
    %55 = vector.shape_cast %54 : vector<1xf32> to vector<1x1xf32>
    %cst_54 = arith.constant dense<0xFF800000> : vector<1xf32>
    %56 = vector.multi_reduction <maximumf>, %41, %cst_54 [0] : vector<16x1xf32> to vector<1xf32>
    %57 = vector.shape_cast %56 : vector<1xf32> to vector<1x1xf32>
    %58 = arith.maximumf %55, %57 : vector<1x1xf32>
    %cst_55 = arith.constant dense<0xFF800000> : vector<1xf32>
    %59 = vector.multi_reduction <maximumf>, %53, %cst_55 [0] : vector<16x1xf32> to vector<1xf32>
    %60 = vector.shape_cast %59 : vector<1xf32> to vector<1x1xf32>
    %61 = arith.maximumf %58, %60 : vector<1x1xf32>
    %62 = vector.broadcast %61 : vector<1x1xf32> to vector<16x1xf32>
    %63 = arith.subf %29, %62 : vector<16x1xf32>
    %64 = math.exp %63 : vector<16x1xf32>
    %65 = vector.broadcast %61 : vector<1x1xf32> to vector<16x1xf32>
    %66 = arith.subf %41, %65 : vector<16x1xf32>
    %67 = math.exp %66 : vector<16x1xf32>
    %68 = vector.broadcast %61 : vector<1x1xf32> to vector<16x1xf32>
    %69 = arith.subf %53, %68 : vector<16x1xf32>
    %70 = math.exp %69 : vector<16x1xf32>
    %cst_56 = arith.constant dense<0.000000e+00> : vector<1xf32>
    %71 = vector.multi_reduction <add>, %64, %cst_56 [0] : vector<16x1xf32> to vector<1xf32>
    %72 = vector.shape_cast %71 : vector<1xf32> to vector<1x1xf32>
    %cst_57 = arith.constant dense<0.000000e+00> : vector<1xf32>
    %73 = vector.multi_reduction <add>, %67, %cst_57 [0] : vector<16x1xf32> to vector<1xf32>
    %74 = vector.shape_cast %73 : vector<1xf32> to vector<1x1xf32>
    %75 = arith.addf %72, %74 : vector<1x1xf32>
    %cst_58 = arith.constant dense<0.000000e+00> : vector<1xf32>
    %76 = vector.multi_reduction <add>, %70, %cst_58 [0] : vector<16x1xf32> to vector<1xf32>
    %77 = vector.shape_cast %76 : vector<1xf32> to vector<1x1xf32>
    %78 = arith.addf %75, %77 : vector<1x1xf32>
    %cst_59 = arith.constant 1.000000e+00 : f32
    %79 = vector.broadcast %cst_59 : f32 to vector<1x1xf32>
    %80 = arith.divf %79, %78 : vector<1x1xf32>
    %81 = vector.broadcast %80 : vector<1x1xf32> to vector<16x1xf32>
    %82 = arith.mulf %64, %81 : vector<16x1xf32>
    %83 = vector.shape_cast %82 : vector<16x1xf32> to vector<1x16x1xf32>
    %84 = vector.broadcast %80 : vector<1x1xf32> to vector<16x1xf32>
    %85 = arith.mulf %67, %84 : vector<16x1xf32>
    %86 = vector.shape_cast %85 : vector<16x1xf32> to vector<1x16x1xf32>
    %87 = vector.broadcast %80 : vector<1x1xf32> to vector<16x1xf32>
    %88 = arith.mulf %70, %87 : vector<16x1xf32>
    %89 = vector.shape_cast %88 : vector<16x1xf32> to vector<1x16x1xf32>
    %90 = vector.broadcast %83 : vector<1x16x1xf32> to vector<1x16x256xf32>
    %91 = arith.mulf %0, %90 : vector<1x16x256xf32>
    %92 = vector.broadcast %86 : vector<1x16x1xf32> to vector<1x16x256xf32>
    %93 = arith.mulf %1, %92 : vector<1x16x256xf32>
    %94 = arith.addf %91, %93 : vector<1x16x256xf32>
    %95 = vector.broadcast %89 : vector<1x16x1xf32> to vector<1x16x256xf32>
    %96 = arith.mulf %2, %95 : vector<1x16x256xf32>
    %97 = arith.addf %94, %96 : vector<1x16x256xf32>
    %c0_60 = arith.constant 0 : index
    %c0_61 = arith.constant 0 : index
    %c0_62 = arith.constant 0 : index
    %98 = vector.load %arg8[%c0_60, %c0_61, %c0_62] : memref<1x16x256xf32, #tpu.memory_space<vmem>>, vector<1x16x256xf32>
    tpu.vector_store %arg8[%c0_60, %c0_61, %c0_62], %97 {strides = array<i32>} : memref<1x16x256xf32, #tpu.memory_space<vmem>>, vector<1x16x256xf32>,
    return
  }
  func.func @transform_0(%arg0: i32) -> (i32, i32, i32) {
    %c0_i32 = arith.constant 0 : i32
    %c0_i32_0 = arith.constant 0 : i32
    %c0_i32_1 = arith.constant 0 : i32
    return %arg0, %c0_i32, %c0_i32_0 : i32, i32, i32
  }
  func.func @transform_1(%arg0: i32) -> (i32, i32, i32) {
    %c0_i32 = arith.constant 0 : i32
    %c0_i32_0 = arith.constant 0 : i32
    %c0_i32_1 = arith.constant 0 : i32
    return %arg0, %c0_i32, %c0_i32_0 : i32, i32, i32
  }
  func.func @transform_2(%arg0: i32) -> (i32, i32, i32) {
    %c0_i32 = arith.constant 0 : i32
    %c0_i32_0 = arith.constant 0 : i32
    %c0_i32_1 = arith.constant 0 : i32
    return %arg0, %c0_i32, %c0_i32_0 : i32, i32, i32
  }
  func.func @transform_3(%arg0: i32) -> (i32, i32, i32) {
    %c0_i32 = arith.constant 0 : i32
    %c0_i32_0 = arith.constant 0 : i32
    %c0_i32_1 = arith.constant 0 : i32
    %c0_i32_2 = arith.constant 0 : i32
    return %c0_i32, %c0_i32_0, %c0_i32_1 : i32, i32, i32
  }
  func.func @transform_4(%arg0: i32) -> (i32, i32, i32) {
    %c0_i32 = arith.constant 0 : i32
    %c0_i32_0 = arith.constant 0 : i32
    %c0_i32_1 = arith.constant 0 : i32
    %c0_i32_2 = arith.constant 0 : i32
    return %c0_i32, %c0_i32_0, %c0_i32_1 : i32, i32, i32
  }
  func.func @transform_5(%arg0: i32) -> (i32, i32, i32) {
    %c0_i32 = arith.constant 0 : i32
    %c0_i32_0 = arith.constant 0 : i32
    %c0_i32_1 = arith.constant 0 : i32
    %c0_i32_2 = arith.constant 0 : i32
    return %c0_i32, %c0_i32_0, %c0_i32_1 : i32, i32, i32
  }
  func.func @transform_6(%arg0: i32) -> (i32, i32, i32) {
    %c0_i32 = arith.constant 0 : i32
    %c0_i32_0 = arith.constant 0 : i32
    %c0_i32_1 = arith.constant 0 : i32
    %c0_i32_2 = arith.constant 0 : i32
    return %c0_i32, %c0_i32_0, %c0_i32_1 : i32, i32, i32
  }
  func.func @transform_7(%arg0: i32) -> (i32, i32, i32) {
    %c0_i32 = arith.constant 0 : i32
    %c0_i32_0 = arith.constant 0 : i32
    %c0_i32_1 = arith.constant 0 : i32
    return %arg0, %c0_i32, %c0_i32_0 : i32, i32, i32
  }
}

</mosaic_0001>

<bundles_post_ra>
// kernel: tpu_custom_call.1
= control target key start
LH: loop header
LB: loop body
LE: loop exit
PB: predicated region body
PF: predicated region fallthrough
CT: control target
= control target key end

     0   :  { %12 = vsyncpa [#allocation3], 0  ;;  %s1873_s0 = inlined_call_operand.vmem [shape: f32[2,16,256], index: 0, kind: input, shape index: {}]   ;;  %s1874_s1 = inlined_call_operand.vmem [shape: f32[2,16,256], index: 1, kind: input, shape index: {}]   ;;  %s1875_s2 = inlined_call_operand.hbm [shape: f32[2,16,256], index: 2, kind: input, shape index: {}]   ;;  %s1876_s3 = inlined_call_operand.hbm [shape: f32[3,4,16], index: 3, kind: input, shape index: {}]   ;;  %s1877_s4 = inlined_call_operand.vmem [shape: f32[3,4,1], index: 4, kind: input, shape index: {}]   ;;  %s1878_s5 = inlined_call_operand.vmem [shape: f32[3,16,4], index: 5, kind: input, shape index: {}]   ;;  %s1879_s6 = inlined_call_operand.vmem [shape: f32[3,16,1], index: 6, kind: input, shape index: {}]   ;;  %s1880_s7 = inlined_call_operand.hbm [shape: f32[2,16,256], index: 7, kind: output, shape index: {}]  }
   0x1   :  { %14 = vsyncpa [#allocation3 + $0x1], 0 }
   0x2   :  { %15 = vsyncpa [#allocation6], 0 }
   0x3   :  { %16 = vsyncpa [#allocation4], 0 }
   0x4   :  { %18 = vsyncpa [#allocation4 + $0x1], 0  ;;  %s1523_s24 = smov 0   ;;  %s1525_s25 = smov 0  }
   0x5   :  { %s1527_s26 = smov 0   ;;  %s1529_s27 = smov 0  }
   0x6 LB: > { %s1544_s28 = sadd.s32 4294967295, %s1468_s27   ;;  %s1148_s29 = sadd.s32 4294967294, %s1468_s27   ;;  %s1468_s27 = sphi %s1529_s27, %s1900_s27   ;;  %s1464_s26 = sphi %s1527_s26, %s1899_s26   ;;  %s1460_s25 = sphi %s1525_s25, %s1898_s25   ;;  %s1456_s24 = sphi %s1523_s24, %s1897_s24  }
   0x7   : > { %p96_p0 = scmp.ne.s32.totalorder %s1460_s25, %s1456_s24  ;;  %p1881_p1 = scmp.eq.s32.totalorder %s1544_s28, 0 }
   0x8   : > { %p210_p3 = scmp.eq.s32.totalorder %s1148_s29, 1  ;;  %p1149_p5 = scmp.ge.s32.totalorder %s1468_s27, 1 }
   0x9   : > { %p1553_p4 = por %p1881_p1, %p96_p0  ;;  %p217_p7 = scmp.lt.s32.totalorder %s1468_s27, 3 }
   0xa   : > { %p1558_p6 = por %p210_p3, %p96_p0  ;;  %s1470_s10 = smov [#allocation5]  }
   0xb   : > { %s1884_s30 = scalar_select %p1553_p4, 1, 0 }
   0xc   : > { %s1885_s8 = scalar_select %p1558_p6, 1, 0 }
   0xd   : > { %p1563_p8 = pnand %p1149_p5, %p217_p7  ;;  %s229_s11 = sshll.u32 %s1470_s10, 4  ;;  %s1567_s11 = int_to_ptr.vmem [resolvable:$true] %s229_s11 }
   0xe   : > { %s1579_s13 = sadd.s32 1, %s1468_s27   ;;  %s83_s14 = sadd.s32 1, %s1464_s26 }
   0xf   : > { %s1886_s9 = scalar_select %p1563_p8, 1, 0 }
  0x10   : > { %p1265_p9 = pneg %p1563_p8  ;;  %s80_s15 = ssub.s32 %s1468_s27, %s1579_s13 }
  0x11   : > { %s1340_s18 = scalar_lea.hbm %s1876_s3, 192 }
  0x12   : > { %p1574_p11 = pnand %p1265_p9, %p1881_p1  ;;  %p1341_p12 = scmp.ne.s32.totalorder %s1876_s3, %s1340_s18 }
  0x13   : > { %p1347_p5 = scmp.lt.u32.totalorder %s1340_s18, %s1876_s3 }
  0x14   : > { %p1342_p13 = pneg %p1574_p11 }
  0x16   : > { %p1343_p0 = pnand %p1342_p13, %p1341_p12 }
  0x18   : > { %p1344_p3 = pneg %p1343_p0 }
  0x1a   : > { %p1349_p7 = pnand %p1347_p5, %p1344_p3 }
  0x1c   : > { %1352 = shalt.err (!%p1349_p7)
}
  0x1d   : > { %s1353_s23 = scalar_lea.vmem %s1567_s11, 192  ;;  %p1361_p2 = scmp.lt.s32.totalorder %s1567_s11, %s1567_s11 }
  0x1e   : > { %p1354_p9 = scmp.ne.s32.totalorder %s1567_s11, %s1353_s23  ;;  %p1362_p6 = scmp.lt.s32.totalorder %s1353_s23, %s1353_s23 }
  0x20   : > { %p1356_p10 = pnand %p1354_p9, %p1342_p13  ;;  %p1363_p4 = por %p1362_p6, %p1361_p2 }
  0x22   : > { %p1357_p1 = pneg %p1356_p10 }
  0x24   : > { %p1364_p8 = pnand %p1363_p4, %p1357_p1 }
  0x26   : > { %1367 = shalt.err (!%p1364_p8)
}
  0x27   : > { %s1471_s29 = smov 64   ;;  %s1472_s10 = smov 4  }
  0x28   : > { %1268 = dma.hbm_to_vmem [thread:$0]  (!%p1574_p11), %s1876_s3, 192, %s1567_s11, [#allocation6], %s1471_s29, %s1471_s29, %s1472_s10  }
  0x29   : > { %p81_p2 = scmp.eq.s32.totalorder %s80_s15, 0  ;;  %p90_p1 = scmp.ne.s32.totalorder %s1464_s26, %s1460_s25 }
  0x2a   : > { %p91_p4 = scmp.eq.s32.totalorder %s1468_s27, 0  ;;  %p1278_p6 = scmp.lt.s32.totalorder %s1468_s27, 2 }
  0x2b   : > { %s1610_s18 = scalar_select %p81_p2, %s1464_s26, %s83_s14  }
  0x2c   : > { %p92_p8 = por %p91_p4, %p90_p1  ;;  %p1888_p10 = scmp.eq.s32.totalorder %s1544_s28, 1 }
  0x2d   : > { %s268_s20 = sand.u32 1, %s1464_s26   ;;  %s1190_s21 = sshll.u32 %s1468_s27, 9 }
  0x2e   : > { %p1614_p12 = por %p1888_p10, %p90_p1  ;;  %s1152_s22 = sshll.u32 %s268_s20, 5 }
  0x2f   : > { %s1623_s16 = scalar_lea.hbm %s1875_s2, %s1190_s21  ;;  %s272_s11 = scalar_lea.vmem [#allocation2], %s1152_s22 }
  0x30   : > { %s279_s14 = sshll.u32 %s272_s11, 4  ;;  %p1625_p11 = pnand %p1278_p6, %p92_p8  ;;  %s1629_s14 = int_to_ptr.vmem [resolvable:$true] %s279_s14 }
  0x31   : > { %s1631_s29 = scalar_lea.sflag [#allocation3], %s268_s20  ;;  %s1368_s10 = scalar_lea.hbm %s1623_s16, 512 }
  0x32   : > { %p1369_p13 = scmp.ne.s32.totalorder %s1623_s16, %s1368_s10  ;;  %p1370_p0 = pneg %p1625_p11 }
  0x33   : > { %s1373_s22 = scalar_lea.hbm %s1875_s2, 1024  ;;  %p1374_p7 = scmp.lt.u32.totalorder %s1623_s16, %s1875_s2 }
  0x34   : > { %p1371_p3 = pnand %p1370_p0, %p1369_p13  ;;  %p1375_p9 = scmp.lt.u32.totalorder %s1373_s22, %s1368_s10 }
  0x35   : > { %p1377_p1 = scmp.lt.u32.totalorder %s1368_s10, %s1623_s16 }
  0x36   : > { %p1372_p5 = pneg %p1371_p3  ;;  %p1376_p2 = por %p1375_p9, %p1374_p7 }
  0x38   : > { %p1378_p4 = por %p1377_p1, %p1376_p2 }
  0x3a   : > { %p1379_p6 = pnand %p1378_p4, %p1372_p5 }
  0x3c   : > { %1382 = shalt.err (!%p1379_p6)
}
  0x3d   : > { %s1383_s20 = scalar_lea.vmem %s1629_s14, 512  ;;  %s1473_s11 = smov [#allocation2]  }
  0x3e   : > { %p1384_p8 = scmp.ne.s32.totalorder %s1629_s14, %s1383_s20  ;;  %s1388_s17 = sshll.u32 %s1473_s11, 4  ;;  %s1389_s17 = int_to_ptr.vmem [resolvable:$false] %s1388_s17 }
  0x3f   : > { %s1390_s21 = scalar_lea.vmem %s1389_s17, 1024  ;;  %p1391_p3 = scmp.lt.s32.totalorder %s1629_s14, %s1389_s17 }
  0x40   : > { %p1386_p10 = pnand %p1384_p8, %p1370_p0  ;;  %p1392_p7 = scmp.lt.s32.totalorder %s1390_s21, %s1383_s20 }
  0x42   : > { %p1387_p13 = pneg %p1386_p10  ;;  %p1393_p9 = por %p1392_p7, %p1391_p3 }
  0x44   : > { %p1394_p2 = pnand %p1393_p9, %p1387_p13 }
  0x46   : > { %1397 = shalt.err (!%p1394_p2)
}
  0x47   : > { %s1474_s10 = smov 256   ;;  %s1475_s22 = smov 16  }
  0x48   : > { %1272 = dma.hbm_to_vmem [thread:$0]  (!%p1625_p11), %s1623_s16, 512, %s1629_s14, %s1631_s29, %s1474_s10, %s1474_s10, %s1475_s22  }
  0x49   : > { %p1891_p0 = scmp.ne.s32.totalorder %s1886_s9, 0 }
  0x4a   : > { %s1662_s12 = sand.u32 (!%p1891_p0), 1, %s1460_s25   ;;  %p1892_p5 = scmp.ne.s32.totalorder (!%p1891_p0), %s1884_s30, 0 }
  0x4b   : > { %291 = sbr.rel (%p1891_p0) target bundleno = 1135 (0x46f), region = 48  ;;  %s1156_s23 = sshll.u32 (!%p1891_p0), %s1662_s12, 5 }
  0x4c   : > { %s294_s20 = scalar_lea.sflag (!%p1891_p0), [#allocation3], %s1662_s12  ;;  %s1668_s11 = scalar_lea.vmem (!%p1891_p0), [#allocation2], %s1156_s23 }
  0x52   : > { %1443 = dma.done.wait (%p1892_p5), %s294_s20, 512  }
  0x53   : > { %1445 = vsyncadd (%p1892_p5), %s294_s20, 4294966784  ;;  %p1893_p11 = scmp.eq.s32.totalorder %s1544_s28, 0 }
  0x55   : > { %1447 = dma.done.wait (%p1893_p11), [#allocation6], 192   ;;  %p1894_p1 = pmov %p1893_p11 }
  0x56   : > { %p342_p4 = scmp.lt.s32.totalorder %s1544_s28, 1  ;;  %v1476_v6 = vmov 0.0|0.0   ;;  %vm1477_vm0 = vmmov 0   ;;  %v1478_v7 = vmov 0.0   ;;  %v1700_v8 = vld [vmem:[%s1668_s11] sm:$0xff]  ;;  %v1713_v14 = vld [vmem:[%s1668_s11 + $0x8] sm:$0xff] }
  0x57   : > { %1449 = vsyncadd (%p1894_p1), [#allocation6], 4294967104  ;;  %1248 = vmatprep.subr.bf16.mxu0 %v1476_v6  ;;  %1216 = vmatprep.mubr.msk.f32.mxu0 %vm1477_vm0, %v1478_v7  ;;  %v380_v15 = vadd.f32 %v1713_v14, %v1700_v8  ;;  %v1720_v17 = vld [vmem:[%s1668_s11 + $0x10] sm:$0xff]  ;;  %v1723_v18 = vld [vmem:[%s1668_s11 + $0x18] sm:$0xff]  ;;  %vm394_vm1 = vcmask 130048   ;;  %vm468_vm2 = vcmask 31744  }
  0x58   : > { %s343_s9 = scalar_select %p342_p4, %s1544_s28, 1  ;;  %v383_v19 = vadd.f32 %v1723_v18, %v1720_v17  ;;  %v388_v25 = vld [vmem:[#allocation5] sm:$0xf]  ;;  %vm475_vm3 = vcmask 1043456   ;;  %v391_v38 = vld [vmem:[%s1878_s5 + $0x8] sm:$0xff]  ;;  %v1168_v44 = vld [vmem:[%s1878_s5 + $0x10] sm:$0xff] }
  0x59   : > { %v390_v26 = vld [vmem:[%s1878_s5] sm:$0xff]  ;;  %v722_v43 = vld [vmem:[#allocation5 + $0x8] sm:$0xf]  ;;  %vm888_vm4 = vcmask 7168   ;;  %v1169_v59 = vld [vmem:[%s1878_s5 + $0x18] sm:$0xff]  ;;  %s341_s14 = scalar_lea.vmem [#allocation7], %s1156_s23 }
  0x5a   : > { %s1191_s16 = sshll.u32 %s343_s9, 5  ;;  %1221 = vmatprep.mubr.msk.f32.mxu1 %vm468_vm2, %v390_v26  ;;  %v389_v29 = vld [vmem:[%s1877_s4] sm:$0xf]  ;;  %v555_v42 = vld [vmem:[#allocation5 + $0x4] sm:$0xf]  ;;  %v393_v45 = vld [vmem:[%s1879_s6 + $0x8] sm:$0xff] }
  0x5b   : > { %s346_s29 = scalar_lea.vmem %s1873_s0, %s1191_s16  ;;  %s351_s21 = scalar_lea.vmem %s1874_s1, %s1191_s16  ;;  %v392_v46 = vld [vmem:[%s1879_s6] sm:$0xff]  ;;  %v1176_v58 = vld [vmem:[%s1877_s4 + $0x8] sm:$0xf] }
  0x5c   : > { %v1683_v0 = vld [vmem:[%s346_s29] sm:$0xff]  ;;  %v1685_v1 = vld [vmem:[%s346_s29 + $0x8] sm:$0xff]  ;;  %v1687_v2 = vld [vmem:[%s346_s29 + $0x10] sm:$0xff]  ;;  %s1041_s15 = sshll.u32 %s341_s14, 4  ;;  %s1480_s10 = smov [#allocation7]   ;;  %s1822_s15 = int_to_ptr.vmem [resolvable:$true] %s1041_s15 }
  0x5d   : > { %v364_v3 = vadd.f32 %v1685_v1, %v1683_v0  ;;  %v1691_v4 = vld [vmem:[%s346_s29 + $0x18] sm:$0xff]  ;;  %v1702_v9 = vld [vmem:[%s351_s21] sm:$0xff]  ;;  %v1704_v10 = vld [vmem:[%s351_s21 + $0x8] sm:$0xff]  ;;  %s1193_s29 = sshll.u32 %s1544_s28, 9  ;;  %s1028_s28 = scalar_lea.sflag [#allocation4], %s1662_s12 }
  0x5e   : > { %v367_v5 = vadd.f32 %v1691_v4, %v1687_v2  ;;  %v1706_v11 = vld [vmem:[%s351_s21 + $0x10] sm:$0xff]  ;;  %v372_v12 = vadd.f32 %v1704_v10, %v1702_v9  ;;  %v1710_v13 = vld [vmem:[%s351_s21 + $0x18] sm:$0xff]  ;;  %v1167_v51 = vld [vmem:[%s1877_s4 + $0x4] sm:$0xf]  ;;  %s1829_s17 = scalar_lea.hbm %s1880_s7, %s1193_s29  ;;  %s1398_s21 = scalar_lea.vmem %s1822_s15, 512 }
  0x5f   : > { %365 = vadd.xlane.f32.xlu0 %v364_v3  ;;  %v375_v16 = vadd.f32 %v1710_v13, %v1706_v11  ;;  %v1177_v60 = vld [vmem:[%s1878_s5 + $0x20] sm:$0xff]  ;;  %v1178_v3 = vld [vmem:[%s1878_s5 + $0x28] sm:$0xff]  ;;  %p1399_p6 = scmp.ne.s32.totalorder %s1822_s15, %s1398_s21  ;;  %s1402_s22 = sshll.u32 %s1480_s10, 4  ;;  %s1403_s22 = int_to_ptr.vmem [resolvable:$false] %s1402_s22 }
  0x60   : > { %373 = vadd.xlane.f32.xlu1 %v372_v12  ;;  %v1170_v12 = vld [vmem:[%s1879_s6 + $0x10] sm:$0xff]  ;;  %s1404_s20 = scalar_lea.vmem %s1403_s22, 1024  ;;  %p1405_p13 = scmp.lt.s32.totalorder %s1822_s15, %s1403_s22 }
  0x61   : > { %p1400_p8 = pnand %p1399_p6, %p1614_p12  ;;  %p1406_p3 = scmp.lt.s32.totalorder %s1404_s20, %s1398_s21 }
  0x63   : > { %368 = vadd.xlane.f32.xlu0 %v367_v5  ;;  %v1479_v5 = vmov 0   ;;  %p1401_p10 = pneg %p1400_p8  ;;  %p1407_p7 = por %p1406_p3, %p1405_p13 }
  0x64   : > { %376 = vadd.xlane.f32.xlu1 %v375_v16  ;;  %1324 = vset.pattern.permute.xlu0 %v1479_v5 }
  0x65   : > { %1325 = vset.pattern.permute.xlu1 %v1479_v5  ;;  %p1408_p9 = pnand %p1407_p7, %p1401_p10 }
  0x67   : > { %381 = vadd.xlane.f32.xlu0 %v380_v15 }
  0x68   : > { %384 = vadd.xlane.f32.xlu1 %v383_v19 }
  0xec   : > { %v366_v20 = vpop.xlane.xlu0 %365 }
  0xed   : > { %v370_v22 = vmul.f32 0.00390625, %v366_v20  ;;  %v374_v27 = vpop.xlane.xlu1 %373 }
  0xee   : > { %v378_v32 = vmul.f32 0.00390625, %v374_v27 }
  0xf0   : > { %v369_v21 = vpop.xlane.xlu0 %368 }
  0xf1   : > { %v371_v23 = vmul.f32 0.00390625, %v369_v21  ;;  %v377_v28 = vpop.xlane.xlu1 %376 }
  0xf2   : > { %v379_v33 = vmul.f32 0.00390625, %v377_v28 }
  0xf3   : > { %v1249_v24 = vpack.c.bf16 %v371_v23, %v370_v22  ;;  %v1180_v22 = vld [vmem:[%s1879_s6 + $0x28] sm:$0xff] }
  0xf4   : > { %v382_v31 = vpop.xlane.xlu0 %381  ;;  %v1252_v40 = vpack.c.bf16 %v379_v33, %v378_v32 }
  0xf5   : > { %1250 = vmatpush3.bf16.msra.mxu0 %v1249_v24  ;;  %v385_v30 = vpop.xlane.xlu1 %384  ;;  %v386_v39 = vmul.f32 0.00390625, %v382_v31  ;;  %v1179_v24 = vld [vmem:[%s1879_s6 + $0x20] sm:$0xff] }
  0xf6   : > { %v387_v37 = vmul.f32 0.00390625, %v385_v30 }
  0xf8   : > { %1217 = vmatmul.mubr.msk.f32.vlgmr.msra.gmra.mrb[0].mxu0 %vm394_vm1, %v388_v25  ;;  %v1255_v41 = vpack.c.bf16 %v387_v37, %v386_v39 }
  0xf9   : > { %1233 = vmatprep.mubr.msk.f32.mxu0 %vm468_vm2, %v1168_v44 }
 0x1cb   : > { %v464_v34 = vpop.f32.mrb[0].mxu0 }
 0x1cc   : > { %v465_v35 = vadd.f32 %v464_v34, %v389_v29  ;;  %v1218_v36 = vpop.f32.mrb[1].mxu0 }
 0x1ce   : > { %1219 = vmatprep.subr.msk.mxu1 %vm475_vm3, %v465_v35 }
 0x1cf   : > { %1220 = vmatpush3.msk.msra.mxu1 %vm475_vm3, %v465_v35 }
 0x1d0   : > { %1222 = vmatmul.mubr.msk.f32.vlgmr.msra.gmra.mrb[0].mxu1 %vm468_vm2, %v391_v38  ;;  %1251 = vmatprep.subr.bf16.mxu1 %v1476_v6 }
 0x1d1   : > { %1253 = vmatpush3.bf16.msra.mxu1 %v1252_v40  ;;  %1228 = vmatprep.mubr.msk.f32.mxu1 %vm1477_vm0, %v1478_v7 }
 0x1d2   : > { %1254 = vmatprep.subr.bf16.mxu1 %v1476_v6 }
 0x1d4   : > { %1229 = vmatmul.mubr.msk.f32.vlgmr.msra.gmra.mrb[2].mxu1 %vm394_vm1, %v555_v42 }
 0x1d5   : > { %1256 = vmatpush3.bf16.msra.mxu1 %v1255_v41  ;;  %1240 = vmatprep.mubr.msk.f32.mxu1 %vm1477_vm0, %v1478_v7  ;;  %v1171_v7 = vld [vmem:[%s1879_s6 + $0x18] sm:$0xff] }
 0x1d8   : > { %1241 = vmatmul.mubr.msk.f32.vlgmr.msra.gmra.mrb[4].mxu1 %vm394_vm1, %v722_v43 }
 0x2a3   : > { %v1223_v47 = vpop.f32.mrb[0].mxu1 }
 0x2a4   : > { %v1755_v48 = vadd.f32 %v1223_v47, %v393_v45  ;;  %v545_v49 = vpop.f32.mrb[1].mxu1 }
 0x2a5   : > { %v1757_v50 = vadd.f32 %v545_v49, %v392_v46 }
 0x2a6   : > { %v890_v52 = vsel %vm888_vm4, %v1755_v48, -inf }
 0x2a7   : > { %v889_v53 = vsel %vm888_vm4, %v1757_v50, -inf  ;;  %v633_v54 = vpop.f32.mrb[2].mxu1 }
 0x2a8   : > { %v891_v55 = vmax.f32 %v889_v53, %v890_v52  ;;  %v634_v56 = vadd.f32 %v1167_v51, %v633_v54  ;;  %v1230_v57 = vpop.f32.mrb[3].mxu1 }
 0x2aa   : > { %1231 = vmatprep.subr.msk.mxu0 %vm475_vm3, %v634_v56  ;;  %v892_v6 = vrot.slane %v891_v55, 4 }
 0x2ab   : > { %1232 = vmatpush3.msk.msra.mxu0 %vm475_vm3, %v634_v56  ;;  %v800_v61 = vpop.f32.mrb[4].mxu1 }
 0x2ac   : > { %v801_v62 = vadd.f32 %v1176_v58, %v800_v61  ;;  %1234 = vmatmul.mubr.msk.f32.vlgmr.msra.gmra.mrb[2].mxu0 %vm468_vm2, %v1169_v59  ;;  %v1242_v63 = vpop.f32.mrb[5].mxu1  ;;  %v893_v16 = vmax.f32 %v891_v55, %v892_v6 }
 0x2ad   : > { %1245 = vmatprep.mubr.msk.f32.mxu0 %vm468_vm2, %v1177_v60 }
 0x2ae   : > { %1243 = vmatprep.subr.msk.mxu0 %vm475_vm3, %v801_v62  ;;  %v894_v27 = vrot.slane %v893_v16, 2 }
 0x2af   : > { %1244 = vmatpush3.msk.msra.mxu0 %vm475_vm3, %v801_v62 }
 0x2b0   : > { %1246 = vmatmul.mubr.msk.f32.vlgmr.msra.gmra.mrb[4].mxu0 %vm468_vm2, %v1178_v3  ;;  %v895_v35 = vmax.f32 %v893_v16, %v894_v27 }
 0x2b2   : > { %v896_v40 = vrot.slane %v895_v35, 1 }
 0x2b4   : > { %v897_v45 = vmax.f32 %v895_v35, %v896_v40 }
 0x37f   : > { %v1235_v15 = vpop.f32.mrb[2].mxu0 }
 0x380   : > { %v718_v19 = vadd.f32 %v1235_v15, %v1171_v7  ;;  %v712_v20 = vpop.f32.mrb[3].mxu0 }
 0x381   : > { %v713_v21 = vadd.f32 %v1170_v12, %v712_v20 }
 0x382   : > { %v899_v23 = vsel %vm888_vm4, %v718_v19, -inf }
 0x383   : > { %v898_v25 = vsel %vm888_vm4, %v713_v21, -inf  ;;  %v1247_v26 = vpop.f32.mrb[4].mxu0 }
 0x384   : > { %v900_v28 = vmax.f32 %v898_v25, %v899_v23  ;;  %v885_v29 = vadd.f32 %v1247_v26, %v1180_v22  ;;  %v879_v30 = vpop.f32.mrb[5].mxu0 }
 0x385   : > { %v880_v31 = vadd.f32 %v1179_v24, %v879_v30 }
 0x386   : > { %v901_v32 = vrot.slane %v900_v28, 4  ;;  %v909_v33 = vsel %vm888_vm4, %v885_v29, -inf }
 0x387   : > { %v908_v34 = vsel %vm888_vm4, %v880_v31, -inf }
 0x388   : > { %v902_v36 = vmax.f32 %v900_v28, %v901_v32  ;;  %v910_v37 = vmax.f32 %v908_v34, %v909_v33 }
 0x38a   : > { %v903_v38 = vrot.slane %v902_v36, 2  ;;  %v911_v39 = vrot.slane %v910_v37, 4 }
 0x38c   : > { %v904_v41 = vmax.f32 %v902_v36, %v903_v38  ;;  %v912_v42 = vmax.f32 %v910_v37, %v911_v39 }
 0x38e   : > { %v905_v43 = vrot.slane %v904_v41, 1  ;;  %v913_v44 = vrot.slane %v912_v42, 2 }
 0x390   : > { %v906_v46 = vmax.f32 %v904_v41, %v905_v43  ;;  %v914_v47 = vmax.f32 %v912_v42, %v913_v44 }
 0x392   : > { %v907_v49 = vmax.f32 %v897_v45, %v906_v46  ;;  %v915_v51 = vrot.slane %v914_v47, 1 }
 0x394   : > { %v916_v52 = vmax.f32 %v914_v47, %v915_v51 }
 0x396   : > { %v917_v53 = vmax.f32 %v907_v49, %v916_v52 }
 0x398   : > { %v918_v54 = vsub.f32 %v1757_v50, %v917_v53  ;;  %v924_v55 = vsub.f32 %v713_v21, %v917_v53  ;;  %v925_v56 = vsub.f32 %v718_v19, %v917_v53  ;;  %v930_v57 = vsub.f32 %v880_v31, %v917_v53 }
 0x399   : > { %v931_v58 = vsub.f32 %v885_v29, %v917_v53  ;;  %v919_v59 = vsub.f32 %v1755_v48, %v917_v53 }
 0x39a   : > { %v920_v60 = vmul.f32 1.442695, %v918_v54  ;;  %v926_v61 = vmul.f32 1.442695, %v924_v55  ;;  %v928_v62 = vmul.f32 1.442695, %v925_v56 }
 0x39b   : > { %v932_v63 = vmul.f32 1.442695, %v930_v57  ;;  %v934_v3 = vmul.f32 1.442695, %v931_v58  ;;  %v922_v5 = vmul.f32 1.442695, %v919_v59 }
 0x39c   : > { %1326 = vpow2.f32 %v920_v60 }
 0x39d   : > { %1328 = vpow2.f32 %v926_v61 }
 0x39e   : > { %1330 = vpow2.f32 %v928_v62 }
 0x39f   : > { %1332 = vpow2.f32 %v932_v63 }
 0x3a0   : > { %1334 = vpow2.f32 %v934_v3 }
 0x3a1   : > { %1336 = vpow2.f32 %v922_v5 }
 0x3a6   : > { %v1327_v6 = vpop.eup %1326 }
 0x3a7   : > { %v1329_v50 = vpop.eup %1328  ;;  %v936_v21 = vsel %vm888_vm4, %v1327_v6, 0.0 }
 0x3a8   : > { %v1331_v7 = vpop.eup %1330  ;;  %v945_v12 = vsel %vm888_vm4, %v1329_v50, 0.0 }
 0x3a9   : > { %v1333_v15 = vpop.eup %1332  ;;  %v946_v48 = vsel %vm888_vm4, %v1331_v7, 0.0 }
 0x3aa   : > { %v1335_v16 = vpop.eup %1334  ;;  %v947_v19 = vadd.f32 %v946_v48, %v945_v12  ;;  %v955_v20 = vsel %vm888_vm4, %v1333_v15, 0.0 }
 0x3ab   : > { %v1337_v22 = vpop.eup %1336  ;;  %v956_v23 = vsel %vm888_vm4, %v1335_v16, 0.0 }
 0x3ac   : > { %v957_v24 = vadd.f32 %v956_v23, %v955_v20  ;;  %v937_v25 = vsel %vm888_vm4, %v1337_v22, 0.0  ;;  %v948_v26 = vrot.slane %v947_v19, 4 }
 0x3ad   : > { %v938_v27 = vadd.f32 %v937_v25, %v936_v21 }
 0x3ae   : > { %v958_v28 = vrot.slane %v957_v24, 4  ;;  %v949_v29 = vadd.f32 %v948_v26, %v947_v19 }
 0x3af   : > { %v939_v30 = vrot.slane %v938_v27, 4 }
 0x3b0   : > { %v959_v31 = vadd.f32 %v958_v28, %v957_v24  ;;  %v950_v32 = vrot.slane %v949_v29, 2 }
 0x3b1   : > { %v940_v33 = vadd.f32 %v939_v30, %v938_v27 }
 0x3b2   : > { %v960_v34 = vrot.slane %v959_v31, 2  ;;  %v951_v35 = vadd.f32 %v950_v32, %v949_v29 }
 0x3b3   : > { %v941_v36 = vrot.slane %v940_v33, 2 }
 0x3b4   : > { %v961_v37 = vadd.f32 %v960_v34, %v959_v31  ;;  %v952_v38 = vrot.slane %v951_v35, 1 }
 0x3b5   : > { %v942_v39 = vadd.f32 %v941_v36, %v940_v33 }
 0x3b6   : > { %v962_v40 = vrot.slane %v961_v37, 1  ;;  %v953_v42 = vadd.f32 %v952_v38, %v951_v35 }
 0x3b7   : > { %v943_v41 = vrot.slane %v942_v39, 1 }
 0x3b8   : > { %v963_v44 = vadd.f32 %v962_v40, %v961_v37 }
 0x3b9   : > { %v944_v43 = vadd.f32 %v943_v41, %v942_v39 }
 0x3bb   : > { %v954_v45 = vadd.f32 %v953_v42, %v944_v43 }
 0x3bd   : > { %v964_v46 = vadd.f32 %v963_v44, %v954_v45 }
 0x3bf   : > { %1338 = vrcp.f32 %v964_v46 }
 0x3c9   : > { %v1339_v47 = vpop.eup %1338 }
 0x3ca   : > { %v968_v49 = vmul.f32 %v1339_v47, %v1337_v22  ;;  %v967_v51 = vmul.f32 %v1339_v47, %v1327_v6  ;;  %v969_v52 = vmul.f32 %v1339_v47, %v1329_v50  ;;  %v970_v53 = vmul.f32 %v1339_v47, %v1331_v7 }
 0x3cb   : > { %v971_v54 = vmul.f32 %v1339_v47, %v1333_v15  ;;  %v972_v55 = vmul.f32 %v1339_v47, %v1335_v16 }
 0x3cc   : > { %980 = vperm.xlu1 %1325, %v968_v49   ;;  %975 = vperm.xlu0 %1324, %v967_v51  }
 0x3d0   : > { %989 = vperm.xlu1 %1325, %v969_v52  }
 0x3d4   : > { %994 = vperm.xlu1 %1325, %v970_v53  }
 0x3d8   : > { %1007 = vperm.xlu1 %1325, %v971_v54  }
 0x3dc   : > { %1012 = vperm.xlu1 %1325, %v972_v55  }
 0x44b   : > { %v981_v56 = vpop.permute.xlu1 %980  ;;  %v976_v58 = vpop.permute.xlu0 %975 }
 0x44c   : > { %v983_v62 = vmul.f32 %v976_v58, %v1683_v0  ;;  %v984_v63 = vmul.f32 %v976_v58, %v1685_v1  ;;  %v986_v0 = vmul.f32 %v981_v56, %v1691_v4 }
 0x44f   : > { %v990_v57 = vpop.permute.xlu1 %989 }
 0x450   : > { %v997_v59 = vmul.f32 %v990_v57, %v1702_v9  ;;  %v998_v60 = vmul.f32 %v990_v57, %v1704_v10  ;;  %v985_v9 = vmul.f32 %v981_v56, %v1687_v2 }
 0x452   : > { %v1001_v3 = vadd.f32 %v997_v59, %v983_v62  ;;  %v1002_v5 = vadd.f32 %v998_v60, %v984_v63 }
 0x453   : > { %v995_v61 = vpop.permute.xlu1 %994 }
 0x454   : > { %v999_v50 = vmul.f32 %v995_v61, %v1706_v11  ;;  %v1000_v7 = vmul.f32 %v995_v61, %v1710_v13 }
 0x456   : > { %v1003_v11 = vadd.f32 %v999_v50, %v985_v9  ;;  %v1004_v16 = vadd.f32 %v1000_v7, %v986_v0 }
 0x457   : > { %v1008_v6 = vpop.permute.xlu1 %1007 }
 0x458   : > { %v1015_v12 = vmul.f32 %v1008_v6, %v1700_v8  ;;  %v1016_v15 = vmul.f32 %v1008_v6, %v1713_v14 }
 0x45a   : > { %v1019_v10 = vadd.f32 %v1015_v12, %v1001_v3  ;;  %v1020_v1 = vadd.f32 %v1016_v15, %v1002_v5 }
 0x45b   : > { %v1013_v48 = vpop.permute.xlu1 %1012 }
 0x45c   : > { %1023 = vst [vmem:[%s341_s14] sm:$0xff] %v1019_v10  ;;  %1024 = vst [vmem:[%s341_s14 + $0x8] sm:$0xff] %v1020_v1  ;;  %v1017_v8 = vmul.f32 %v1013_v48, %v1720_v17  ;;  %v1018_v2 = vmul.f32 %v1013_v48, %v1723_v18 }
 0x45e   : > { %v1021_v4 = vadd.f32 %v1017_v8, %v1003_v11  ;;  %v1022_v13 = vadd.f32 %v1018_v2, %v1004_v16 }
 0x460   : > { %1025 = vst [vmem:[%s341_s14 + $0x10] sm:$0xff] %v1021_v4  ;;  %1026 = vst [vmem:[%s341_s14 + $0x18] sm:$0xff] %v1022_v13 }
 0x461   : > { %1411 = shalt.err (!%p1408_p9)
}
 0x462   : > { %s1412_s11 = scalar_lea.hbm %s1829_s17, 512  ;;  %s1416_s14 = scalar_lea.hbm %s1880_s7, 1024 }
 0x463   : > { %p1413_p2 = scmp.ne.s32.totalorder %s1829_s17, %s1412_s11  ;;  %p1417_p11 = scmp.lt.u32.totalorder %s1829_s17, %s1880_s7 }
 0x464   : > { %p1418_p1 = scmp.lt.u32.totalorder %s1416_s14, %s1412_s11  ;;  %p1420_p6 = scmp.lt.u32.totalorder %s1412_s11, %s1829_s17 }
 0x465   : > { %p1414_p0 = pnand %p1413_p2, %p1614_p12 }
 0x466   : > { %p1419_p4 = por %p1418_p1, %p1417_p11 }
 0x467   : > { %p1415_p5 = pneg %p1414_p0 }
 0x468   : > { %p1421_p8 = por %p1420_p6, %p1419_p4 }
 0x46a   : > { %p1422_p10 = pnand %p1421_p8, %p1415_p5 }
 0x46c   : > { %1425 = shalt.err (!%p1422_p10)
}
 0x46d   : > { %s1481_s30 = smov 256   ;;  %s1482_s21 = smov 16  }
 0x46e   : > { %1263 = dma.vmem_to_hbm [thread:$0]  (%p1614_p12), %s1822_s15, 512, %s1829_s17, %s1028_s28, %s1481_s30, %s1481_s30, %s1482_s21  }
 0x46f PF: > { %s1056_s10 = sand.u32 1, %s1456_s24   ;;  %p1895_p13 = scmp.ne.s32.totalorder %s1885_s8, 0 }
 0x470   : > { %p1896_p3 = scmp.ge.s32.totalorder %s1468_s27, 2  ;;  %s1057_s22 = scalar_lea.sflag [#allocation4], %s1056_s10 }
 0x472   : > { %p1274_p7 = pnand %p1896_p3, %p1895_p13 }
 0x474   : > { %1451 = dma.done.wait (!%p1274_p7), %s1057_s22, 512  }
 0x475   : > { %1453 = vsyncadd (!%p1274_p7), %s1057_s22, 4294966784  ;;  %p21_p9 = scmp.ge.s32.totalorder %s1579_s13, 4   ;;  %s1897_s24 = smov %s1460_s25 }
 0x476   : > { %s1898_s25 = smov %s1464_s26  ;;  %s1899_s26 = smov %s1610_s18 }
 0x477   : > { %s1900_s27 = smov %s1579_s13  ;;  %23 = sbr.rel (!%p21_p9) target bundleno = 6 (0x6), region = 111 }
 0x47e   :  { %1062 = vsyncpa [#allocation3], 1 }
 0x47f   :  { %1064 = vsyncpa [#allocation3 + $0x1], 1 }
 0x480   :  { %1065 = vsyncpa [#allocation6], 1 }
 0x481   :  { %1066 = vsyncpa [#allocation4], 1 }
 0x482   :  { %1068 = vsyncpa [#allocation4 + $0x1], 1 }

</bundles_post_ra>
